<compile_context>
chip_gen: v7x
topology: tpu7x:2x2x1
jax: 0.10.0
libtpu: 0.0.40
codegen_flags: <defaults>
</compile_context>

<pallas_src>
from functools import partial

import jax
import jax.numpy as jnp
from jax.experimental import pallas as pl
from jax.experimental.pallas import tpu as pltpu


def _round_up(x, m):
    return ((x + m - 1) // m) * m


def _knn_kernel(rt_ref, rn_ref, q_ref, d_ref, i_ref, *, k, n_ref, use_bf16_dot):
    # rt_ref: (Nr, D)  reference points, transposed once in the wrapper (resident)
    # rn_ref: (Nr, 1)  precomputed squared norms of the reference points
    # q_ref:  (D, TQ)  query tile; queries on the lane axis
    # d_ref:  (k, TQ)  ascending distances (lane-dense rows)
    # i_ref:  (k, TQ)  0-based reference indices
    r = rt_ref[...]                                   # (Nr, D) f32
    q = q_ref[...]                                    # (D, TQ) f32
    rn = rn_ref[...]                                  # (Nr, 1) f32

    qn = jnp.sum(q * q, axis=0, keepdims=True)        # (1, TQ)
    q2 = -2.0 * q                                     # fold -2 into small operand

    if use_bf16_dot:
        # Optional bf16 MXU path (v6e/v7x); keep f32 accumulation + f32 norms.
        dot = jnp.dot(r.astype(jnp.bfloat16), q2.astype(jnp.bfloat16),
                      preferred_element_type=jnp.float32)   # (Nr, TQ)
    else:
        dot = jnp.dot(r, q2, preferred_element_type=jnp.float32)

    dist2 = jnp.maximum(rn + qn + dot, 0.0)           # (Nr, TQ), numerical floor

    iota = jax.lax.broadcasted_iota(jnp.int32, dist2.shape, 0)   # ref idx per row
    work = dist2
    big = jnp.float32(3.0e38)

    # Iterative k-way selection; k is a small static int -> unrolled.
    for j in range(k):
        mval = jnp.min(work, axis=0, keepdims=True)                        # (1, TQ)
        midx = jnp.min(jnp.where(work == mval, iota, n_ref), axis=0,
                       keepdims=True)                                      # (1, TQ)
        d_ref[pl.ds(j, 1), :] = jnp.sqrt(mval)        # lane-dense (1, TQ) store
        i_ref[pl.ds(j, 1), :] = midx
        # knock out the selected reference so the next iteration finds the next one
        work = jnp.where(iota == midx, big, work)


def knn_pallas(ref, query, k, *, use_bf16_dot=False):
    """ref: (D, Nr) float, query: (D, Nq) float  ->  d, i of shape (k, Nq)."""
    D, Nr = ref.shape
    D2, Nq = query.shape
    assert D == D2, "feature dims must match"

    ref = ref.astype(jnp.float32)
    query = query.astype(jnp.float32)

    # Query-tile size: multiple of 128 lanes, up to 256 (matches 2x256 MXU tiles).
    TQ = min(256, _round_up(Nq, 128))
    Nq_pad = _round_up(Nq, TQ)
    if Nq_pad != Nq:
        query = jnp.pad(query, ((0, 0), (0, Nq_pad - Nq)))

    # One-time wrapper glue: standard-layout matmul operand + hoisted ||r||^2.
    ref_t = jnp.transpose(ref, (1, 0))                     # (Nr, D)
    rn = jnp.sum(ref * ref, axis=0)[:, None]               # (Nr, 1)

    grid = (Nq_pad // TQ,)

    # VMEM budget: dominated by the (Nr, TQ) f32 distance tile (+ selection temps)
    # plus the resident/double-buffered inputs.  Cap at 64 MiB (v7x physical).
    dist_bytes = 4 * Nr * TQ
    vmem_limit = int(min(64 * 1024 * 1024,
                         max(32 * 1024 * 1024,
                             6 * dist_bytes + 8 * 4 * Nr * D + (2 << 20))))

    flops = 2.0 * Nq_pad * Nr * D + 5.0 * k * Nq_pad * Nr
    bytes_accessed = 4.0 * (Nr * D + Nr + D * Nq_pad + 2 * k * Nq_pad)

    d, i = pl.pallas_call(
        partial(_knn_kernel, k=k, n_ref=Nr, use_bf16_dot=use_bf16_dot),
        grid=grid,
        in_specs=[
            pl.BlockSpec((Nr, D), lambda t: (0, 0)),    # resident reference block
            pl.BlockSpec((Nr, 1), lambda t: (0, 0)),    # resident ||r||^2
            pl.BlockSpec((D, TQ), lambda t: (0, t)),    # query tile (pipelined)
        ],
        out_specs=(
            pl.BlockSpec((k, TQ), lambda t: (0, t)),
            pl.BlockSpec((k, TQ), lambda t: (0, t)),
        ),
        out_shape=(
            jax.ShapeDtypeStruct((k, Nq_pad), jnp.float32),
            jax.ShapeDtypeStruct((k, Nq_pad), jnp.int32),
        ),
        compiler_params=pltpu.CompilerParams(
            dimension_semantics=("parallel",),
            vmem_limit_bytes=vmem_limit),
        cost_estimate=pl.CostEstimate(
            flops=int(flops),
            transcendentals=int(k * Nq_pad),
            bytes_accessed=int(bytes_accessed)),
    )(ref_t, rn, query)

    if Nq_pad != Nq:
        d = d[:, :Nq]
        i = i[:, :Nq]
    return d, i


def _T(t, mode=False):
    if mode:
        return jnp.transpose(t, (1, 0))
    return t


class KNN:
    """JAX/Pallas equivalent of the PyTorch KNN module."""

    def __init__(self, k, transpose_mode=False):
        self.k = k
        self._t = transpose_mode

    def __call__(self, ref, query, grad=True):
        ref, query = _T(ref, self._t), _T(query, self._t)       # -> (dim, n)
        d, i = knn_pallas(ref.astype(jnp.float32),
                          query.astype(jnp.float32), self.k)    # (k, n_query)
        return _T(d, self._t), _T(i, self._t)


def _reference_knn(ref, query, k):
    """Pure-JAX (XLA) reference for validation."""
    dist2 = (jnp.sum(query * query, axis=0)[:, None]
             + jnp.sum(ref * ref, axis=0)[None, :]
             - 2.0 * query.T @ ref)                              # (Nq, Nr)
    dist = jnp.sqrt(jnp.maximum(dist2, 0.0))
    neg_top, idx = jax.lax.top_k(-dist, k)                       # (Nq, k)
    return (-neg_top).T, dist                                    # (k, Nq), (Nq, Nr)


if __name__ == "__main__":
    key = jax.random.PRNGKey(0)
    k_ref, k_qry, k_ref2, k_qry2 = jax.random.split(key, 4)

    # --- small single-tile check ---
    dim, n_ref, n_query, k = 8, 64, 32, 4
    ref = jax.random.normal(k_ref, (dim, n_ref), dtype=jnp.float32)
    query = jax.random.normal(k_qry, (dim, n_query), dtype=jnp.float32)

    knn_mod = KNN(k=k, transpose_mode=False)
    d, i = knn_mod(ref, query)
    d, i = jax.block_until_ready(d), jax.block_until_ready(i)

    d_ref, dist_full = _reference_knn(ref, query, k)
    assert d.shape == (k, n_query) and i.shape == (k, n_query)
    assert jnp.allclose(d, d_ref, atol=1e-4, rtol=1e-4)
    gathered = jnp.take_along_axis(dist_full, i.T.astype(jnp.int32), axis=1).T
    assert jnp.allclose(gathered, d, atol=1e-4, rtol=1e-4)

    # --- multi-tile check (exercises the query-axis grid + padding/slicing) ---
    n_query2 = 300
    ref2 = jax.random.normal(k_ref2, (dim, n_ref), dtype=jnp.float32)
    query2 = jax.random.normal(k_qry2, (dim, n_query2), dtype=jnp.float32)
    d2, i2 = knn_mod(ref2, query2)
    d2, i2 = jax.block_until_ready(d2), jax.block_until_ready(i2)
    d2_ref, dist2_full = _reference_knn(ref2, query2, k)
    assert d2.shape == (k, n_query2) and i2.shape == (k, n_query2)
    assert jnp.allclose(d2, d2_ref, atol=1e-4, rtol=1e-4)
    gathered2 = jnp.take_along_axis(dist2_full, i2.T.astype(jnp.int32), axis=1).T
    assert jnp.allclose(gathered2, d2, atol=1e-4, rtol=1e-4)

    print("KERNEL_OK")
</pallas_src>

<mosaic_0001>
module attributes {stable_mosaic.version = 11 : i64} {
  func.func @_knn_kernel(%arg0: i32, %arg1: memref<64x8xf32, #tpu.memory_space<vmem>>, %arg2: memref<64x1xf32, #tpu.memory_space<vmem>>, %arg3: memref<8x128xf32, #tpu.memory_space<vmem>>, %arg4: memref<4x128xf32, #tpu.memory_space<vmem>>, %arg5: memref<4x128xi32, #tpu.memory_space<vmem>>) attributes {dimension_semantics = [#tpu.dimension_semantics<parallel>], iteration_bounds = array<i64: 1>, scalar_prefetch = 0 : i64, scratch_operands = 0 : i64, tpu.core_type = #tpu.core_type<tc>, window_params = [{pipeline_mode = #tpu.pipeline_mode<synchronous>, transform_indices = @transform_0, window_bounds = array<i64: 64, 8>}, {pipeline_mode = #tpu.pipeline_mode<synchronous>, transform_indices = @transform_1, window_bounds = array<i64: 64, 1>}, {transform_indices = @transform_2, window_bounds = array<i64: 8, 128>}, {transform_indices = @transform_3, window_bounds = array<i64: 4, 128>}, {transform_indices = @transform_4, window_bounds = array<i64: 4, 128>}]} {
    %c0 = arith.constant 0 : index
    %c0_0 = arith.constant 0 : index
    %0 = vector.load %arg1[%c0, %c0_0] : memref<64x8xf32, #tpu.memory_space<vmem>>, vector<64x8xf32>
    %c0_1 = arith.constant 0 : index
    %c0_2 = arith.constant 0 : index
    %1 = vector.load %arg3[%c0_1, %c0_2] : memref<8x128xf32, #tpu.memory_space<vmem>>, vector<8x128xf32>
    %c0_3 = arith.constant 0 : index
    %c0_4 = arith.constant 0 : index
    %2 = vector.load %arg2[%c0_3, %c0_4] : memref<64x1xf32, #tpu.memory_space<vmem>>, vector<64x1xf32>
    %3 = arith.mulf %1, %1 : vector<8x128xf32>
    %cst = arith.constant dense<0.000000e+00> : vector<128xf32>
    %4 = vector.multi_reduction <add>, %3, %cst [0] : vector<8x128xf32> to vector<128xf32>
    %5 = vector.shape_cast %4 : vector<128xf32> to vector<1x128xf32>
    %cst_5 = arith.constant -2.000000e+00 : f32
    %6 = vector.broadcast %cst_5 : f32 to vector<8x128xf32>
    %7 = arith.mulf %6, %1 : vector<8x128xf32>
    %cst_6 = arith.constant dense<0.000000e+00> : vector<64x128xf32>
    %8 = tpu.matmul %0, %7, %cst_6 {dimension_numbers = #tpu.dot_dimension_numbers<[1], [0], [0], [1], [0, 0, 1, 1], [], []>} : vector<64x8xf32>, vector<8x128xf32>, vector<64x128xf32> -> vector<64x128xf32>
    %9 = vector.broadcast %2 : vector<64x1xf32> to vector<64x128xf32>
    %10 = vector.broadcast %5 : vector<1x128xf32> to vector<64x128xf32>
    %11 = arith.addf %9, %10 : vector<64x128xf32>
    %12 = arith.addf %11, %8 : vector<64x128xf32>
    %cst_7 = arith.constant 0.000000e+00 : f32
    %13 = vector.broadcast %cst_7 : f32 to vector<64x128xf32>
    %14 = arith.maximumf %12, %13 : vector<64x128xf32>
    %15 = tpu.iota {dimensions = array<i32: 0>} : vector<64x128xi32>
    %cst_8 = arith.constant dense<0x7F800000> : vector<128xf32>
    %16 = vector.multi_reduction <minimumf>, %14, %cst_8 [0] : vector<64x128xf32> to vector<128xf32>
    %17 = vector.shape_cast %16 : vector<128xf32> to vector<1x128xf32>
    %18 = vector.broadcast %17 : vector<1x128xf32> to vector<64x128xf32>
    %19 = arith.cmpf oeq, %14, %18 : vector<64x128xf32>
    %c64_i32 = arith.constant 64 : i32
    %20 = vector.broadcast %c64_i32 : i32 to vector<64x128xi32>
    %21 = arith.select %19, %15, %20 : vector<64x128xi1>, vector<64x128xi32>
    %cst_9 = arith.constant dense<2147483647> : vector<128xi32>
    %22 = vector.multi_reduction <minsi>, %21, %cst_9 [0] : vector<64x128xi32> to vector<128xi32>
    %23 = vector.shape_cast %22 : vector<128xi32> to vector<1x128xi32>
    %24 = math.sqrt %17 : vector<1x128xf32>
    %c0_10 = arith.constant 0 : index
    %c0_11 = arith.constant 0 : index
    %25 = vector.load %arg4[%c0_10, %c0_11] : memref<4x128xf32, #tpu.memory_space<vmem>>, vector<1x128xf32>
    tpu.vector_store %arg4[%c0_10, %c0_11], %24 {strides = array<i32>} : memref<4x128xf32, #tpu.memory_space<vmem>>, vector<1x128xf32>,
    %c0_12 = arith.constant 0 : index
    %c0_13 = arith.constant 0 : index
    %26 = vector.load %arg5[%c0_12, %c0_13] : memref<4x128xi32, #tpu.memory_space<vmem>>, vector<1x128xi32>
    tpu.vector_store %arg5[%c0_12, %c0_13], %23 {strides = array<i32>} : memref<4x128xi32, #tpu.memory_space<vmem>>, vector<1x128xi32>,
    %27 = vector.broadcast %23 : vector<1x128xi32> to vector<64x128xi32>
    %28 = arith.cmpi eq, %15, %27 : vector<64x128xi32>
    %cst_14 = arith.constant 3.000000e+38 : f32
    %29 = vector.broadcast %cst_14 : f32 to vector<64x128xf32>
    %30 = arith.select %28, %29, %14 : vector<64x128xi1>, vector<64x128xf32>
    %cst_15 = arith.constant dense<0x7F800000> : vector<128xf32>
    %31 = vector.multi_reduction <minimumf>, %30, %cst_15 [0] : vector<64x128xf32> to vector<128xf32>
    %32 = vector.shape_cast %31 : vector<128xf32> to vector<1x128xf32>
    %33 = vector.broadcast %32 : vector<1x128xf32> to vector<64x128xf32>
    %34 = arith.cmpf oeq, %30, %33 : vector<64x128xf32>
    %c64_i32_16 = arith.constant 64 : i32
    %35 = vector.broadcast %c64_i32_16 : i32 to vector<64x128xi32>
    %36 = arith.select %34, %15, %35 : vector<64x128xi1>, vector<64x128xi32>
    %cst_17 = arith.constant dense<2147483647> : vector<128xi32>
    %37 = vector.multi_reduction <minsi>, %36, %cst_17 [0] : vector<64x128xi32> to vector<128xi32>
    %38 = vector.shape_cast %37 : vector<128xi32> to vector<1x128xi32>
    %39 = math.sqrt %32 : vector<1x128xf32>
    %c1 = arith.constant 1 : index
    %c0_18 = arith.constant 0 : index
    %40 = vector.load %arg4[%c1, %c0_18] : memref<4x128xf32, #tpu.memory_space<vmem>>, vector<1x128xf32>
    tpu.vector_store %arg4[%c1, %c0_18], %39 {strides = array<i32>} : memref<4x128xf32, #tpu.memory_space<vmem>>, vector<1x128xf32>,
    %c1_19 = arith.constant 1 : index
    %c0_20 = arith.constant 0 : index
    %41 = vector.load %arg5[%c1_19, %c0_20] : memref<4x128xi32, #tpu.memory_space<vmem>>, vector<1x128xi32>
    tpu.vector_store %arg5[%c1_19, %c0_20], %38 {strides = array<i32>} : memref<4x128xi32, #tpu.memory_space<vmem>>, vector<1x128xi32>,
    %42 = vector.broadcast %38 : vector<1x128xi32> to vector<64x128xi32>
    %43 = arith.cmpi eq, %15, %42 : vector<64x128xi32>
    %cst_21 = arith.constant 3.000000e+38 : f32
    %44 = vector.broadcast %cst_21 : f32 to vector<64x128xf32>
    %45 = arith.select %43, %44, %30 : vector<64x128xi1>, vector<64x128xf32>
    %cst_22 = arith.constant dense<0x7F800000> : vector<128xf32>
    %46 = vector.multi_reduction <minimumf>, %45, %cst_22 [0] : vector<64x128xf32> to vector<128xf32>
    %47 = vector.shape_cast %46 : vector<128xf32> to vector<1x128xf32>
    %48 = vector.broadcast %47 : vector<1x128xf32> to vector<64x128xf32>
    %49 = arith.cmpf oeq, %45, %48 : vector<64x128xf32>
    %c64_i32_23 = arith.constant 64 : i32
    %50 = vector.broadcast %c64_i32_23 : i32 to vector<64x128xi32>
    %51 = arith.select %49, %15, %50 : vector<64x128xi1>, vector<64x128xi32>
    %cst_24 = arith.constant dense<2147483647> : vector<128xi32>
    %52 = vector.multi_reduction <minsi>, %51, %cst_24 [0] : vector<64x128xi32> to vector<128xi32>
    %53 = vector.shape_cast %52 : vector<128xi32> to vector<1x128xi32>
    %54 = math.sqrt %47 : vector<1x128xf32>
    %c2 = arith.constant 2 : index
    %c0_25 = arith.constant 0 : index
    %55 = vector.load %arg4[%c2, %c0_25] : memref<4x128xf32, #tpu.memory_space<vmem>>, vector<1x128xf32>
    tpu.vector_store %arg4[%c2, %c0_25], %54 {strides = array<i32>} : memref<4x128xf32, #tpu.memory_space<vmem>>, vector<1x128xf32>,
    %c2_26 = arith.constant 2 : index
    %c0_27 = arith.constant 0 : index
    %56 = vector.load %arg5[%c2_26, %c0_27] : memref<4x128xi32, #tpu.memory_space<vmem>>, vector<1x128xi32>
    tpu.vector_store %arg5[%c2_26, %c0_27], %53 {strides = array<i32>} : memref<4x128xi32, #tpu.memory_space<vmem>>, vector<1x128xi32>,
    %57 = vector.broadcast %53 : vector<1x128xi32> to vector<64x128xi32>
    %58 = arith.cmpi eq, %15, %57 : vector<64x128xi32>
    %cst_28 = arith.constant 3.000000e+38 : f32
    %59 = vector.broadcast %cst_28 : f32 to vector<64x128xf32>
    %60 = arith.select %58, %59, %45 : vector<64x128xi1>, vector<64x128xf32>
    %cst_29 = arith.constant dense<0x7F800000> : vector<128xf32>
    %61 = vector.multi_reduction <minimumf>, %60, %cst_29 [0] : vector<64x128xf32> to vector<128xf32>
    %62 = vector.shape_cast %61 : vector<128xf32> to vector<1x128xf32>
    %63 = vector.broadcast %62 : vector<1x128xf32> to vector<64x128xf32>
    %64 = arith.cmpf oeq, %60, %63 : vector<64x128xf32>
    %c64_i32_30 = arith.constant 64 : i32
    %65 = vector.broadcast %c64_i32_30 : i32 to vector<64x128xi32>
    %66 = arith.select %64, %15, %65 : vector<64x128xi1>, vector<64x128xi32>
    %cst_31 = arith.constant dense<2147483647> : vector<128xi32>
    %67 = vector.multi_reduction <minsi>, %66, %cst_31 [0] : vector<64x128xi32> to vector<128xi32>
    %68 = vector.shape_cast %67 : vector<128xi32> to vector<1x128xi32>
    %69 = math.sqrt %62 : vector<1x128xf32>
    %c3 = arith.constant 3 : index
    %c0_32 = arith.constant 0 : index
    %70 = vector.load %arg4[%c3, %c0_32] : memref<4x128xf32, #tpu.memory_space<vmem>>, vector<1x128xf32>
    tpu.vector_store %arg4[%c3, %c0_32], %69 {strides = array<i32>} : memref<4x128xf32, #tpu.memory_space<vmem>>, vector<1x128xf32>,
    %c3_33 = arith.constant 3 : index
    %c0_34 = arith.constant 0 : index
    %71 = vector.load %arg5[%c3_33, %c0_34] : memref<4x128xi32, #tpu.memory_space<vmem>>, vector<1x128xi32>
    tpu.vector_store %arg5[%c3_33, %c0_34], %68 {strides = array<i32>} : memref<4x128xi32, #tpu.memory_space<vmem>>, vector<1x128xi32>,
    return
  }
  func.func @transform_0(%arg0: i32) -> (i32, i32) {
    %c0_i32 = arith.constant 0 : i32
    %c0_i32_0 = arith.constant 0 : i32
    %c0_i32_1 = arith.constant 0 : i32
    return %c0_i32, %c0_i32_0 : i32, i32
  }
  func.func @transform_1(%arg0: i32) -> (i32, i32) {
    %c0_i32 = arith.constant 0 : i32
    %c0_i32_0 = arith.constant 0 : i32
    %c0_i32_1 = arith.constant 0 : i32
    return %c0_i32, %c0_i32_0 : i32, i32
  }
  func.func @transform_2(%arg0: i32) -> (i32, i32) {
    %c0_i32 = arith.constant 0 : i32
    %c0_i32_0 = arith.constant 0 : i32
    return %c0_i32, %arg0 : i32, i32
  }
  func.func @transform_3(%arg0: i32) -> (i32, i32) {
    %c0_i32 = arith.constant 0 : i32
    %c0_i32_0 = arith.constant 0 : i32
    return %c0_i32, %arg0 : i32, i32
  }
  func.func @transform_4(%arg0: i32) -> (i32, i32) {
    %c0_i32 = arith.constant 0 : i32
    %c0_i32_0 = arith.constant 0 : i32
    return %c0_i32, %arg0 : i32, i32
  }
}

</mosaic_0001>

<bundles_post_ra>
// kernel: tpu_custom_call.1
= control target key start
LH: loop header
LB: loop body
LE: loop exit
PB: predicated region body
PF: predicated region fallthrough
CT: control target
= control target key end

     0   :  { %10 = vsyncpa [#allocation3], 0  ;;  %vm43_vm0 = vcmask 64512   ;;  %v660_v6 = vmov 0   ;;  %s977_s0 = inlined_call_operand.vmem [shape: f32[64,8], index: 0, kind: input, shape index: {}]   ;;  %s978_s1 = inlined_call_operand.vmem [shape: f32[64,1], index: 1, kind: input, shape index: {}]   ;;  %s979_s2 = inlined_call_operand.vmem [shape: f32[8,128], index: 2, kind: input, shape index: {}]   ;;  %s980_s3 = inlined_call_operand.hbm [shape: f32[4,128], index: 3, kind: output, shape index: {0}]   ;;  %s981_s4 = inlined_call_operand.hbm [shape: s32[4,128], index: 4, kind: output, shape index: {1}]  }
   0x1   :  { %v26_v0 = vld [vmem:[%s979_s2] sm:$0xff]  ;;  %v19_v4 = vld [vmem:[%s977_s0 + $0x8] sm:$0xff]  ;;  %603 = vset.pattern.permute.xlu1 %v660_v6  ;;  %602 = vset.pattern.permute.xlu0 %v660_v6  ;;  %v20_v7 = vld [vmem:[%s977_s0 + $0x10] sm:$0xff] }
   0x2   :  { %v18_v1 = vld [vmem:[%s977_s0] sm:$0xff]  ;;  %v42_v3 = vmul.f32 -2.0, %v26_v0  ;;  %v23_v5 = vld [vmem:[%s977_s0 + $0x28] sm:$0xff]  ;;  %v24_v8 = vld [vmem:[%s977_s0 + $0x30] sm:$0xff] }
   0x3   :  { %v22_v2 = vld [vmem:[%s977_s0 + $0x20] sm:$0xff]  ;;  %585 = vmatprep.mubr.msk.f32.mxu0 %vm43_vm0, %v18_v1  ;;  %v29_v9 = vld [vmem:[%s978_s1 + $0x10] sm:$0xff] }
   0x4   :  { %591 = vmatprep.mubr.msk.f32.mxu1 %vm43_vm0, %v22_v2  ;;  %583 = vmatprep.subr.mxu0 %v42_v3  ;;  %v27_v10 = vld [vmem:[%s978_s1] sm:$0xff] }
   0x5   :  { %597 = vmatprep.subr.mxu1 %v42_v3  ;;  %584 = vmatpush3.msra.mxu0 %v42_v3 }
   0x6   :  { %598 = vmatpush3.msra.mxu1 %v42_v3  ;;  %586 = vmatmul.mubr.msk.f32.vlgmr.msra.gmra.mrb[0].mxu0 %vm43_vm0, %v19_v4 }
   0x7   :  { %592 = vmatmul.mubr.msk.f32.vlgmr.msra.gmra.mrb[0].mxu1 %vm43_vm0, %v23_v5 }
   0x8   :  { %11 = vsyncpa [#allocation5], 0  ;;  %588 = vmatprep.mubr.msk.f32.mxu0 %vm43_vm0, %v20_v7  ;;  %594 = vmatprep.mubr.msk.f32.mxu1 %vm43_vm0, %v24_v8  ;;  %v21_v11 = vld [vmem:[%s977_s0 + $0x18] sm:$0xff]  ;;  %v28_v14 = vld [vmem:[%s978_s1 + $0x8] sm:$0xff]  ;;  %v35_v19 = vmul.f32 %v26_v0, %v26_v0  ;;  %s662_s22 = smov [#allocation4]  }
   0x9   :  { %v25_v12 = vld [vmem:[%s977_s0 + $0x38] sm:$0xff]  ;;  %185 = vperm.xlu1 %603, %v29_v9   ;;  %175 = vperm.xlu0 %602, %v27_v10   ;;  %v32_v15 = vld [vmem:[%s978_s1 + $0x28] sm:$0xff]  ;;  %v31_v16 = vld [vmem:[%s978_s1 + $0x20] sm:$0xff]  ;;  %v237_v10 = vlaneseq  ;;  %s554_s23 = sshll.u32 %s662_s22, 4  ;;  %s946_s23 = int_to_ptr.vmem [resolvable:$true] %s554_s23 }
   0xa   :  { %v30_v13 = vld [vmem:[%s978_s1 + $0x18] sm:$0xff]  ;;  %589 = vmatmul.mubr.msk.f32.gmra.mrb[2].mxu0 %vm43_vm0, %v21_v11  ;;  %v33_v18 = vld [vmem:[%s978_s1 + $0x30] sm:$0xff]  ;;  %v36_v20 = vrot.slane %v35_v19, 4 }
   0xb   :  { %595 = vmatmul.mubr.msk.f32.gmra.mrb[2].mxu1 %vm43_vm0, %v25_v12  ;;  %v34_v17 = vld [vmem:[%s978_s1 + $0x38] sm:$0xff]  ;;  %s661_s1 = smov [#allocation2]  }
   0xc   :  { %v37_v21 = vadd.f32 %v36_v20, %v35_v19  ;;  %s544_s21 = sshll.u32 %s661_s1, 4  ;;  %s545_s21 = int_to_ptr.vmem [resolvable:$true] %s544_s21 }
   0xd   :  { %190 = vperm.xlu1 %603, %v30_v13   ;;  %180 = vperm.xlu0 %602, %v28_v14   ;;  %v771_v13 = vshrl.u32 %v237_v10, 7  ;;  %s612_s2 = scalar_lea.vmem %s545_s21, 64  ;;  %p617_p1 = scmp.lt.s32.totalorder %s545_s21, %s545_s21 }
   0xe   :  { %v38_v24 = vrot.slane %v37_v21, 2  ;;  %p613_p0 = scmp.ne.s32.totalorder %s545_s21, %s612_s2  ;;  %p618_p2 = scmp.lt.s32.totalorder %s612_s2, %s612_s2 }
   0xf   :  { %v783_v20 = vadd.s32 32, %v771_v13 }
  0x10   :  { %v39_v25 = vadd.f32 %v38_v24, %v37_v21  ;;  %v786_v21 = vadd.s32 40, %v771_v13  ;;  %p619_p3 = por %p618_p2, %p617_p1 }
  0x11   :  { %200 = vperm.xlu1 %603, %v32_v15   ;;  %195 = vperm.xlu0 %602, %v31_v16   ;;  %v774_v16 = vadd.s32 8, %v771_v13 }
  0x12   :  { %v40_v28 = vrot.slane %v39_v25, 1  ;;  %p620_p4 = pnand %p619_p3, %p613_p0 }
  0x14   :  { %v41_v31 = vadd.f32 %v40_v28, %v39_v25 }
  0x15   :  { %210 = vperm.xlu1 %603, %v34_v17   ;;  %205 = vperm.xlu0 %602, %v33_v18   ;;  %v777_v17 = vadd.s32 16, %v771_v13  ;;  %v780_v18 = vadd.s32 24, %v771_v13 }
  0x88   :  { %v186_v22 = vpop.permute.xlu1 %185  ;;  %v176_v23 = vpop.permute.xlu0 %175 }
  0x89   :  { %v213_v36 = vadd.f32 %v176_v23, %v41_v31  ;;  %v215_v50 = vadd.f32 %v186_v22, %v41_v31  ;;  %v789_v22 = vadd.s32 48, %v771_v13  ;;  %v792_v23 = vadd.s32 56, %v771_v13 }
  0x8c   :  { %v191_v26 = vpop.permute.xlu1 %190  ;;  %v181_v27 = vpop.permute.xlu0 %180 }
  0x8d   :  { %v214_v32 = vadd.f32 %v181_v27, %v41_v31  ;;  %v216_v46 = vadd.f32 %v191_v26, %v41_v31 }
  0x90   :  { %v201_v29 = vpop.permute.xlu1 %200  ;;  %v196_v30 = vpop.permute.xlu0 %195 }
  0x91   :  { %v218_v33 = vadd.f32 %v201_v29, %v41_v31  ;;  %v217_v37 = vadd.f32 %v196_v30, %v41_v31 }
  0x94   :  { %v211_v34 = vpop.permute.xlu1 %210  ;;  %v206_v35 = vpop.permute.xlu0 %205 }
  0x95   :  { %v220_v47 = vadd.f32 %v211_v34, %v41_v31  ;;  %v219_v51 = vadd.f32 %v206_v35, %v41_v31 }
  0xd9   :  { %v587_v38 = vpop.f32.mrb[0].mxu0 }
  0xda   :  { %v593_v39 = vpop.f32.mrb[0].mxu1  ;;  %v222_v40 = vadd.f32 %v587_v38, %v214_v32  ;;  %v134_v42 = vpop.f32.mrb[1].mxu0 }
  0xdb   :  { %v226_v41 = vadd.f32 %v593_v39, %v218_v33  ;;  %v154_v43 = vpop.f32.mrb[1].mxu1  ;;  %v221_v44 = vadd.f32 %v213_v36, %v134_v42 }
  0xdc   :  { %v225_v45 = vadd.f32 %v217_v37, %v154_v43  ;;  %v747_v48 = vmax.f32 %v222_v40, 0.0 }
  0xdd   :  { %v749_v49 = vmax.f32 %v226_v41, 0.0  ;;  %v751_v52 = vmax.f32 %v221_v44, 0.0  ;;  %v590_v54 = vpop.f32.mrb[2].mxu0 }
  0xde   :  { %v753_v53 = vmax.f32 %v225_v45, 0.0  ;;  %v596_v55 = vpop.f32.mrb[2].mxu1  ;;  %v224_v57 = vadd.f32 %v590_v54, %v216_v46  ;;  %v144_v59 = vpop.f32.mrb[3].mxu0 }
  0xdf   :  { %v247_v56 = vmin.f32 %v747_v48, %v749_v49  ;;  %v228_v58 = vadd.f32 %v596_v55, %v220_v47  ;;  %v164_v60 = vpop.f32.mrb[3].mxu1  ;;  %v223_v62 = vadd.f32 %v215_v50, %v144_v59 }
  0xe0   :  { %v246_v61 = vmin.f32 %v751_v52, %v753_v53  ;;  %v227_v63 = vadd.f32 %v219_v51, %v164_v60  ;;  %v759_v0 = vmax.f32 %v224_v57, 0.0 }
  0xe1   :  { %v761_v1 = vmax.f32 %v228_v58, 0.0  ;;  %v763_v3 = vmax.f32 %v223_v62, 0.0 }
  0xe2   :  { %v250_v2 = vmin.f32 %v246_v61, %v247_v56  ;;  %v765_v4 = vmax.f32 %v227_v63, 0.0 }
  0xe3   :  { %v249_v5 = vmin.f32 %v759_v0, %v761_v1 }
  0xe4   :  { %v248_v6 = vmin.f32 %v763_v3, %v765_v4 }
  0xe6   :  { %v251_v7 = vmin.f32 %v248_v6, %v249_v5 }
  0xe8   :  { %v252_v8 = vmin.f32 %v250_v2, %v251_v7 }
  0xea   :  { %v253_v9 = vrot.slane %v252_v8, 4 }
  0xec   :  { %v254_v11 = vmin.f32 %v252_v8, %v253_v9 }
  0xee   :  { %v255_v12 = vrot.slane %v254_v11, 2 }
  0xf0   :  { %v256_v14 = vmin.f32 %v254_v11, %v255_v12 }
  0xf2   :  { %v257_v15 = vrot.slane %v256_v14, 1 }
  0xf4   :  { %v258_v19 = vmin.f32 %v256_v14, %v257_v15 }
  0xf6   :  { %vm259_vm1 = vcmp.eq.f32.partialorder %v751_v52, %v258_v19  ;;  %vm260_vm2 = vcmp.eq.f32.partialorder %v747_v48, %v258_v19  ;;  %vm261_vm3 = vcmp.eq.f32.partialorder %v763_v3, %v258_v19  ;;  %vm262_vm4 = vcmp.eq.f32.partialorder %v759_v0, %v258_v19 }
  0xf7   :  { %vm263_vm5 = vcmp.eq.f32.partialorder %v753_v53, %v258_v19  ;;  %vm264_vm6 = vcmp.eq.f32.partialorder %v749_v49, %v258_v19  ;;  %vm265_vm7 = vcmp.eq.f32.partialorder %v765_v4, %v258_v19  ;;  %vm266_vm8 = vcmp.eq.f32.partialorder %v761_v1, %v258_v19 }
  0xf8   :  { %v267_v24 = vsel %vm259_vm1, %v771_v13, 64  ;;  %v268_v25 = vsel %vm260_vm2, %v774_v16, 64  ;;  %v269_v26 = vsel %vm261_vm3, %v777_v17, 64  ;;  %v270_v27 = vsel %vm262_vm4, %v780_v18, 64 }
  0xf9   :  { %v271_v28 = vsel %vm263_vm5, %v783_v20, 64  ;;  %v272_v29 = vsel %vm264_vm6, %v786_v21, 64  ;;  %v273_v30 = vsel %vm265_vm7, %v789_v22, 64  ;;  %v274_v31 = vsel %vm266_vm8, %v792_v23, 64 }
  0xfa   :  { %vm275_vm9 = vcmp.lt.s32.totalorder %v267_v24, %v271_v28  ;;  %vm277_vm10 = vcmp.lt.s32.totalorder %v268_v25, %v272_v29  ;;  %vm279_vm11 = vcmp.lt.s32.totalorder %v269_v26, %v273_v30  ;;  %vm281_vm12 = vcmp.lt.s32.totalorder %v270_v27, %v274_v31 }
  0xfb   :  { %v276_v32 = vsel %vm275_vm9, %v267_v24, %v271_v28  ;;  %v278_v33 = vsel %vm277_vm10, %v268_v25, %v272_v29  ;;  %v280_v34 = vsel %vm279_vm11, %v269_v26, %v273_v30  ;;  %v282_v35 = vsel %vm281_vm12, %v270_v27, %v274_v31 }
  0xfc   :  { %vm283_vm13 = vcmp.lt.s32.totalorder %v276_v32, %v278_v33  ;;  %vm285_vm14 = vcmp.lt.s32.totalorder %v280_v34, %v282_v35  ;;  %604 = vrsqrt.f32 %v258_v19  ;;  %vm300_vm2 = vcmp.eq.f32.partialorder %v258_v19, inf }
  0xfd   :  { %v284_v36 = vsel %vm283_vm13, %v276_v32, %v278_v33  ;;  %v286_v37 = vsel %vm285_vm14, %v280_v34, %v282_v35  ;;  %v303_v46 = vand.u32 2147483648, %v258_v19  ;;  %vm302_vm3 = vcmp.eq.f32.partialorder %v258_v19, 0.0 }
  0xfe   :  { %vm287_vm15 = vcmp.lt.s32.totalorder %v284_v36, %v286_v37 }
  0xff   :  { %v288_v38 = vsel %vm287_vm15, %v284_v36, %v286_v37 }
 0x100   :  { %v289_v39 = vrot.slane %v288_v38, 4 }
 0x102   :  { %vm290_vm0 = vcmp.lt.s32.totalorder %v288_v38, %v289_v39 }
 0x103   :  { %v291_v40 = vsel %vm290_vm0, %v288_v38, %v289_v39 }
 0x104   :  { %v292_v41 = vrot.slane %v291_v40, 2 }
 0x106   :  { %v605_v42 = vpop.eup %604  ;;  %vm293_vm1 = vcmp.lt.s32.totalorder %v291_v40, %v292_v41 }
 0x107   :  { %v294_v43 = vsel %vm293_vm1, %v291_v40, %v292_v41  ;;  %v299_v44 = vmul.f32 %v605_v42, %v258_v19 }
 0x108   :  { %v295_v45 = vrot.slane %v294_v43, 1 }
 0x109   :  { %v301_v47 = vsel %vm300_vm2, %v258_v19, %v299_v44 }
 0x10a   :  { %vm296_vm4 = vcmp.lt.s32.totalorder %v294_v43, %v295_v45  ;;  %v304_v50 = vsel %vm302_vm3, %v303_v46, %v301_v47 }
 0x10b   :  { %v297_v51 = vsel %vm296_vm4, %v294_v43, %v295_v45  ;;  %305 = vst [vmem:[#allocation2] sm:$0x1] %v304_v50 }
 0x10c   :  { %vm307_vm5 = vcmp.eq.s32.totalorder %v771_v13, %v297_v51  ;;  %vm308_vm6 = vcmp.eq.s32.totalorder %v774_v16, %v297_v51  ;;  %vm309_vm7 = vcmp.eq.s32.totalorder %v777_v17, %v297_v51  ;;  %vm310_vm8 = vcmp.eq.s32.totalorder %v780_v18, %v297_v51  ;;  %306 = vst [vmem:[#allocation4] sm:$0x1] %v297_v51 }
 0x10d   :  { %vm311_vm9 = vcmp.eq.s32.totalorder %v783_v20, %v297_v51  ;;  %vm312_vm10 = vcmp.eq.s32.totalorder %v786_v21, %v297_v51  ;;  %vm313_vm11 = vcmp.eq.s32.totalorder %v789_v22, %v297_v51  ;;  %vm314_vm12 = vcmp.eq.s32.totalorder %v792_v23, %v297_v51 }
 0x10e   :  { %v819_v54 = vsel %vm307_vm5, 3e+38, %v751_v52  ;;  %v822_v55 = vsel %vm308_vm6, 3e+38, %v747_v48  ;;  %v825_v56 = vsel %vm309_vm7, 3e+38, %v763_v3 }
 0x10f   :  { %v828_v57 = vsel %vm310_vm8, 3e+38, %v759_v0  ;;  %v831_v58 = vsel %vm311_vm9, 3e+38, %v753_v53  ;;  %v834_v59 = vsel %vm312_vm10, 3e+38, %v749_v49 }
 0x110   :  { %v837_v60 = vsel %vm313_vm11, 3e+38, %v765_v4  ;;  %v840_v52 = vsel %vm314_vm12, 3e+38, %v761_v1  ;;  %v323_v48 = vmin.f32 %v819_v54, %v831_v58  ;;  %v324_v61 = vmin.f32 %v822_v55, %v834_v59 }
 0x111   :  { %v325_v62 = vmin.f32 %v825_v56, %v837_v60  ;;  %v326_v53 = vmin.f32 %v828_v57, %v840_v52 }
 0x112   :  { %v327_v49 = vmin.f32 %v323_v48, %v324_v61 }
 0x113   :  { %v328_v63 = vmin.f32 %v325_v62, %v326_v53 }
 0x115   :  { %v329_v0 = vmin.f32 %v327_v49, %v328_v63 }
 0x117   :  { %v330_v2 = vrot.slane %v329_v0, 4 }
 0x119   :  { %v331_v3 = vmin.f32 %v329_v0, %v330_v2 }
 0x11b   :  { %v332_v4 = vrot.slane %v331_v3, 2 }
 0x11d   :  { %v333_v1 = vmin.f32 %v331_v3, %v332_v4 }
 0x11f   :  { %v334_v5 = vrot.slane %v333_v1, 1 }
 0x121   :  { %v335_v6 = vmin.f32 %v333_v1, %v334_v5 }
 0x123   :  { %vm336_vm13 = vcmp.eq.f32.partialorder %v819_v54, %v335_v6  ;;  %vm337_vm14 = vcmp.eq.f32.partialorder %v822_v55, %v335_v6  ;;  %vm338_vm15 = vcmp.eq.f32.partialorder %v825_v56, %v335_v6  ;;  %vm339_vm0 = vcmp.eq.f32.partialorder %v828_v57, %v335_v6 }
 0x124   :  { %vm340_vm1 = vcmp.eq.f32.partialorder %v831_v58, %v335_v6  ;;  %vm341_vm2 = vcmp.eq.f32.partialorder %v834_v59, %v335_v6  ;;  %vm342_vm3 = vcmp.eq.f32.partialorder %v837_v60, %v335_v6  ;;  %vm343_vm4 = vcmp.eq.f32.partialorder %v840_v52, %v335_v6 }
 0x125   :  { %v344_v7 = vsel %vm336_vm13, %v771_v13, 64  ;;  %v345_v8 = vsel %vm337_vm14, %v774_v16, 64  ;;  %v346_v9 = vsel %vm338_vm15, %v777_v17, 64  ;;  %v347_v10 = vsel %vm339_vm0, %v780_v18, 64 }
 0x126   :  { %v348_v11 = vsel %vm340_vm1, %v783_v20, 64  ;;  %v349_v12 = vsel %vm341_vm2, %v786_v21, 64  ;;  %v350_v14 = vsel %vm342_vm3, %v789_v22, 64  ;;  %v351_v15 = vsel %vm343_vm4, %v792_v23, 64 }
 0x127   :  { %vm352_vm5 = vcmp.lt.s32.totalorder %v344_v7, %v348_v11  ;;  %vm354_vm6 = vcmp.lt.s32.totalorder %v345_v8, %v349_v12  ;;  %vm356_vm7 = vcmp.lt.s32.totalorder %v346_v9, %v350_v14  ;;  %vm358_vm8 = vcmp.lt.s32.totalorder %v347_v10, %v351_v15 }
 0x128   :  { %v353_v19 = vsel %vm352_vm5, %v344_v7, %v348_v11  ;;  %v355_v24 = vsel %vm354_vm6, %v345_v8, %v349_v12  ;;  %v357_v25 = vsel %vm356_vm7, %v346_v9, %v350_v14  ;;  %v359_v26 = vsel %vm358_vm8, %v347_v10, %v351_v15 }
 0x129   :  { %vm360_vm9 = vcmp.lt.s32.totalorder %v353_v19, %v355_v24  ;;  %vm362_vm10 = vcmp.lt.s32.totalorder %v357_v25, %v359_v26  ;;  %606 = vrsqrt.f32 %v335_v6  ;;  %vm377_vm14 = vcmp.eq.f32.partialorder %v335_v6, inf }
 0x12a   :  { %v361_v27 = vsel %vm360_vm9, %v353_v19, %v355_v24  ;;  %v363_v28 = vsel %vm362_vm10, %v357_v25, %v359_v26  ;;  %v380_v37 = vand.u32 2147483648, %v335_v6  ;;  %vm379_vm15 = vcmp.eq.f32.partialorder %v335_v6, 0.0 }
 0x12b   :  { %vm364_vm11 = vcmp.lt.s32.totalorder %v361_v27, %v363_v28 }
 0x12c   :  { %v365_v29 = vsel %vm364_vm11, %v361_v27, %v363_v28 }
 0x12d   :  { %v366_v30 = vrot.slane %v365_v29, 4 }
 0x12f   :  { %vm367_vm12 = vcmp.lt.s32.totalorder %v365_v29, %v366_v30 }
 0x130   :  { %v368_v31 = vsel %vm367_vm12, %v365_v29, %v366_v30 }
 0x131   :  { %v369_v32 = vrot.slane %v368_v31, 2 }
 0x133   :  { %v607_v33 = vpop.eup %606  ;;  %vm370_vm13 = vcmp.lt.s32.totalorder %v368_v31, %v369_v32 }
 0x134   :  { %v371_v34 = vsel %vm370_vm13, %v368_v31, %v369_v32  ;;  %v376_v35 = vmul.f32 %v607_v33, %v335_v6 }
 0x135   :  { %v372_v36 = vrot.slane %v371_v34, 1 }
 0x136   :  { %v378_v38 = vsel %vm377_vm14, %v335_v6, %v376_v35 }
 0x137   :  { %vm373_vm0 = vcmp.lt.s32.totalorder %v371_v34, %v372_v36  ;;  %v381_v39 = vsel %vm379_vm15, %v380_v37, %v378_v38 }
 0x138   :  { %v374_v40 = vsel %vm373_vm0, %v371_v34, %v372_v36  ;;  %382 = vst [vmem:[#allocation2 + $0x1] sm:$0x1] %v381_v39 }
 0x139   :  { %vm384_vm1 = vcmp.eq.s32.totalorder %v771_v13, %v374_v40  ;;  %vm385_vm2 = vcmp.eq.s32.totalorder %v774_v16, %v374_v40  ;;  %vm386_vm3 = vcmp.eq.s32.totalorder %v777_v17, %v374_v40  ;;  %vm387_vm4 = vcmp.eq.s32.totalorder %v780_v18, %v374_v40  ;;  %383 = vst [vmem:[#allocation4 + $0x1] sm:$0x1] %v374_v40 }
 0x13a   :  { %vm388_vm5 = vcmp.eq.s32.totalorder %v783_v20, %v374_v40  ;;  %vm389_vm6 = vcmp.eq.s32.totalorder %v786_v21, %v374_v40  ;;  %vm390_vm7 = vcmp.eq.s32.totalorder %v789_v22, %v374_v40  ;;  %vm391_vm8 = vcmp.eq.s32.totalorder %v792_v23, %v374_v40 }
 0x13b   :  { %v875_v41 = vsel %vm384_vm1, 3e+38, %v819_v54  ;;  %v878_v42 = vsel %vm385_vm2, 3e+38, %v822_v55  ;;  %v881_v43 = vsel %vm386_vm3, 3e+38, %v825_v56 }
 0x13c   :  { %v884_v44 = vsel %vm387_vm4, 3e+38, %v828_v57  ;;  %v887_v45 = vsel %vm388_vm5, 3e+38, %v831_v58  ;;  %v890_v46 = vsel %vm389_vm6, 3e+38, %v834_v59 }
 0x13d   :  { %v893_v47 = vsel %vm390_vm7, 3e+38, %v837_v60  ;;  %v896_v50 = vsel %vm391_vm8, 3e+38, %v840_v52  ;;  %v400_v51 = vmin.f32 %v875_v41, %v887_v45  ;;  %v401_v54 = vmin.f32 %v878_v42, %v890_v46 }
 0x13e   :  { %v402_v55 = vmin.f32 %v881_v43, %v893_v47  ;;  %v403_v56 = vmin.f32 %v884_v44, %v896_v50 }
 0x13f   :  { %v404_v57 = vmin.f32 %v400_v51, %v401_v54 }
 0x140   :  { %v405_v58 = vmin.f32 %v402_v55, %v403_v56 }
 0x142   :  { %v406_v59 = vmin.f32 %v404_v57, %v405_v58 }
 0x144   :  { %v407_v60 = vrot.slane %v406_v59, 4 }
 0x146   :  { %v408_v48 = vmin.f32 %v406_v59, %v407_v60 }
 0x148   :  { %v409_v61 = vrot.slane %v408_v48, 2 }
 0x14a   :  { %v410_v52 = vmin.f32 %v408_v48, %v409_v61 }
 0x14c   :  { %v411_v62 = vrot.slane %v410_v52, 1 }
 0x14e   :  { %v412_v53 = vmin.f32 %v410_v52, %v411_v62 }
 0x150   :  { %vm413_vm9 = vcmp.eq.f32.partialorder %v875_v41, %v412_v53  ;;  %vm414_vm10 = vcmp.eq.f32.partialorder %v878_v42, %v412_v53  ;;  %vm415_vm11 = vcmp.eq.f32.partialorder %v881_v43, %v412_v53  ;;  %vm416_vm12 = vcmp.eq.f32.partialorder %v884_v44, %v412_v53 }
 0x151   :  { %vm417_vm13 = vcmp.eq.f32.partialorder %v887_v45, %v412_v53  ;;  %vm418_vm14 = vcmp.eq.f32.partialorder %v890_v46, %v412_v53  ;;  %vm419_vm15 = vcmp.eq.f32.partialorder %v893_v47, %v412_v53  ;;  %vm420_vm0 = vcmp.eq.f32.partialorder %v896_v50, %v412_v53 }
 0x152   :  { %v421_v49 = vsel %vm413_vm9, %v771_v13, 64  ;;  %v422_v63 = vsel %vm414_vm10, %v774_v16, 64  ;;  %v423_v0 = vsel %vm415_vm11, %v777_v17, 64  ;;  %v424_v2 = vsel %vm416_vm12, %v780_v18, 64 }
 0x153   :  { %v425_v3 = vsel %vm417_vm13, %v783_v20, 64  ;;  %v426_v4 = vsel %vm418_vm14, %v786_v21, 64  ;;  %v427_v1 = vsel %vm419_vm15, %v789_v22, 64  ;;  %v428_v5 = vsel %vm420_vm0, %v792_v23, 64 }
 0x154   :  { %vm429_vm1 = vcmp.lt.s32.totalorder %v421_v49, %v425_v3  ;;  %vm431_vm2 = vcmp.lt.s32.totalorder %v422_v63, %v426_v4  ;;  %vm433_vm3 = vcmp.lt.s32.totalorder %v423_v0, %v427_v1  ;;  %vm435_vm4 = vcmp.lt.s32.totalorder %v424_v2, %v428_v5 }
 0x155   :  { %v430_v6 = vsel %vm429_vm1, %v421_v49, %v425_v3  ;;  %v432_v7 = vsel %vm431_vm2, %v422_v63, %v426_v4  ;;  %v434_v8 = vsel %vm433_vm3, %v423_v0, %v427_v1  ;;  %v436_v9 = vsel %vm435_vm4, %v424_v2, %v428_v5 }
 0x156   :  { %vm437_vm5 = vcmp.lt.s32.totalorder %v430_v6, %v432_v7  ;;  %vm439_vm6 = vcmp.lt.s32.totalorder %v434_v8, %v436_v9  ;;  %608 = vrsqrt.f32 %v412_v53  ;;  %vm454_vm10 = vcmp.eq.f32.partialorder %v412_v53, inf }
 0x157   :  { %v438_v10 = vsel %vm437_vm5, %v430_v6, %v432_v7  ;;  %v440_v11 = vsel %vm439_vm6, %v434_v8, %v436_v9  ;;  %v457_v28 = vand.u32 2147483648, %v412_v53  ;;  %vm456_vm11 = vcmp.eq.f32.partialorder %v412_v53, 0.0 }
 0x158   :  { %vm441_vm7 = vcmp.lt.s32.totalorder %v438_v10, %v440_v11 }
 0x159   :  { %v442_v12 = vsel %vm441_vm7, %v438_v10, %v440_v11 }
 0x15a   :  { %v443_v14 = vrot.slane %v442_v12, 4 }
 0x15c   :  { %vm444_vm8 = vcmp.lt.s32.totalorder %v442_v12, %v443_v14 }
 0x15d   :  { %v445_v15 = vsel %vm444_vm8, %v442_v12, %v443_v14 }
 0x15e   :  { %v446_v19 = vrot.slane %v445_v15, 2 }
 0x160   :  { %v609_v24 = vpop.eup %608  ;;  %vm447_vm9 = vcmp.lt.s32.totalorder %v445_v15, %v446_v19 }
 0x161   :  { %v448_v25 = vsel %vm447_vm9, %v445_v15, %v446_v19  ;;  %v453_v26 = vmul.f32 %v609_v24, %v412_v53 }
 0x162   :  { %v449_v27 = vrot.slane %v448_v25, 1 }
 0x163   :  { %v455_v29 = vsel %vm454_vm10, %v412_v53, %v453_v26 }
 0x164   :  { %vm450_vm12 = vcmp.lt.s32.totalorder %v448_v25, %v449_v27  ;;  %v458_v30 = vsel %vm456_vm11, %v457_v28, %v455_v29 }
 0x165   :  { %v451_v31 = vsel %vm450_vm12, %v448_v25, %v449_v27  ;;  %459 = vst [vmem:[#allocation2 + $0x2] sm:$0x1] %v458_v30 }
 0x166   :  { %vm461_vm13 = vcmp.eq.s32.totalorder %v771_v13, %v451_v31  ;;  %vm462_vm14 = vcmp.eq.s32.totalorder %v774_v16, %v451_v31  ;;  %vm463_vm15 = vcmp.eq.s32.totalorder %v777_v17, %v451_v31  ;;  %vm464_vm0 = vcmp.eq.s32.totalorder %v780_v18, %v451_v31  ;;  %460 = vst [vmem:[#allocation4 + $0x2] sm:$0x1] %v451_v31 }
 0x167   :  { %vm465_vm1 = vcmp.eq.s32.totalorder %v783_v20, %v451_v31  ;;  %vm466_vm2 = vcmp.eq.s32.totalorder %v786_v21, %v451_v31  ;;  %vm467_vm3 = vcmp.eq.s32.totalorder %v789_v22, %v451_v31  ;;  %vm468_vm4 = vcmp.eq.s32.totalorder %v792_v23, %v451_v31 }
 0x168   :  { %v469_v32 = vsel %vm461_vm13, 3e+38, %v875_v41  ;;  %v470_v33 = vsel %vm462_vm14, 3e+38, %v878_v42  ;;  %v471_v34 = vsel %vm463_vm15, 3e+38, %v881_v43 }
 0x169   :  { %v472_v35 = vsel %vm464_vm0, 3e+38, %v884_v44  ;;  %v473_v36 = vsel %vm465_vm1, 3e+38, %v887_v45  ;;  %v474_v37 = vsel %vm466_vm2, 3e+38, %v890_v46 }
 0x16a   :  { %v475_v38 = vsel %vm467_vm3, 3e+38, %v893_v47  ;;  %v476_v39 = vsel %vm468_vm4, 3e+38, %v896_v50  ;;  %v477_v40 = vmin.f32 %v469_v32, %v473_v36  ;;  %v478_v51 = vmin.f32 %v470_v33, %v474_v37 }
 0x16b   :  { %v479_v54 = vmin.f32 %v471_v34, %v475_v38  ;;  %v480_v55 = vmin.f32 %v472_v35, %v476_v39 }
 0x16c   :  { %v481_v56 = vmin.f32 %v477_v40, %v478_v51 }
 0x16d   :  { %v482_v41 = vmin.f32 %v479_v54, %v480_v55 }
 0x16f   :  { %v483_v57 = vmin.f32 %v481_v56, %v482_v41 }
 0x171   :  { %v484_v42 = vrot.slane %v483_v57, 4 }
 0x173   :  { %v485_v58 = vmin.f32 %v483_v57, %v484_v42 }
 0x175   :  { %v486_v43 = vrot.slane %v485_v58, 2 }
 0x177   :  { %v487_v59 = vmin.f32 %v485_v58, %v486_v43 }
 0x179   :  { %v488_v44 = vrot.slane %v487_v59, 1 }
 0x17b   :  { %v489_v60 = vmin.f32 %v487_v59, %v488_v44 }
 0x17d   :  { %vm490_vm5 = vcmp.eq.f32.partialorder %v469_v32, %v489_v60  ;;  %vm491_vm6 = vcmp.eq.f32.partialorder %v470_v33, %v489_v60  ;;  %vm492_vm7 = vcmp.eq.f32.partialorder %v471_v34, %v489_v60  ;;  %vm493_vm8 = vcmp.eq.f32.partialorder %v472_v35, %v489_v60 }
 0x17e   :  { %vm494_vm9 = vcmp.eq.f32.partialorder %v473_v36, %v489_v60  ;;  %vm495_vm10 = vcmp.eq.f32.partialorder %v474_v37, %v489_v60  ;;  %vm496_vm11 = vcmp.eq.f32.partialorder %v475_v38, %v489_v60  ;;  %vm497_vm12 = vcmp.eq.f32.partialorder %v476_v39, %v489_v60 }
 0x17f   :  { %v498_v45 = vsel %vm490_vm5, %v771_v13, 64  ;;  %v499_v46 = vsel %vm491_vm6, %v774_v16, 64  ;;  %v500_v47 = vsel %vm492_vm7, %v777_v17, 64  ;;  %v501_v50 = vsel %vm493_vm8, %v780_v18, 64 }
 0x180   :  { %v502_v48 = vsel %vm494_vm9, %v783_v20, 64  ;;  %v503_v61 = vsel %vm495_vm10, %v786_v21, 64  ;;  %v504_v52 = vsel %vm496_vm11, %v789_v22, 64  ;;  %v505_v62 = vsel %vm497_vm12, %v792_v23, 64 }
 0x181   :  { %vm506_vm13 = vcmp.lt.s32.totalorder %v498_v45, %v502_v48  ;;  %vm508_vm14 = vcmp.lt.s32.totalorder %v499_v46, %v503_v61  ;;  %vm510_vm15 = vcmp.lt.s32.totalorder %v500_v47, %v504_v52  ;;  %vm512_vm0 = vcmp.lt.s32.totalorder %v501_v50, %v505_v62 }
 0x182   :  { %v507_v53 = vsel %vm506_vm13, %v498_v45, %v502_v48  ;;  %v509_v13 = vsel %vm508_vm14, %v499_v46, %v503_v61  ;;  %v511_v49 = vsel %vm510_vm15, %v500_v47, %v504_v52  ;;  %v513_v16 = vsel %vm512_vm0, %v501_v50, %v505_v62 }
 0x183   :  { %vm514_vm1 = vcmp.lt.s32.totalorder %v507_v53, %v509_v13  ;;  %vm516_vm2 = vcmp.lt.s32.totalorder %v511_v49, %v513_v16  ;;  %610 = vrsqrt.f32 %v489_v60  ;;  %vm531_vm6 = vcmp.eq.f32.partialorder %v489_v60, inf }
 0x184   :  { %v515_v17 = vsel %vm514_vm1, %v507_v53, %v509_v13  ;;  %v517_v18 = vsel %vm516_vm2, %v511_v49, %v513_v16  ;;  %v534_v3 = vand.u32 2147483648, %v489_v60  ;;  %vm533_vm7 = vcmp.eq.f32.partialorder %v489_v60, 0.0 }
 0x185   :  { %vm518_vm3 = vcmp.lt.s32.totalorder %v515_v17, %v517_v18 }
 0x186   :  { %v519_v20 = vsel %vm518_vm3, %v515_v17, %v517_v18 }
 0x187   :  { %v520_v21 = vrot.slane %v519_v20, 4 }
 0x189   :  { %vm521_vm4 = vcmp.lt.s32.totalorder %v519_v20, %v520_v21 }
 0x18a   :  { %v522_v22 = vsel %vm521_vm4, %v519_v20, %v520_v21 }
 0x18b   :  { %v523_v63 = vrot.slane %v522_v22, 2 }
 0x18d   :  { %v611_v23 = vpop.eup %610  ;;  %vm524_vm5 = vcmp.lt.s32.totalorder %v522_v22, %v523_v63 }
 0x18e   :  { %v530_v0 = vmul.f32 %v611_v23, %v489_v60  ;;  %v525_v2 = vsel %vm524_vm5, %v522_v22, %v523_v63 }
 0x18f   :  { %v526_v4 = vrot.slane %v525_v2, 1 }
 0x190   :  { %v532_v1 = vsel %vm531_vm6, %v489_v60, %v530_v0 }
 0x191   :  { %v535_v5 = vsel %vm533_vm7, %v534_v3, %v532_v1  ;;  %vm527_vm8 = vcmp.lt.s32.totalorder %v525_v2, %v526_v4 }
 0x192   :  { %536 = vst [vmem:[#allocation2 + $0x3] sm:$0x1] %v535_v5  ;;  %v528_v6 = vsel %vm527_vm8, %v525_v2, %v526_v4 }
 0x193   :  { %623 = shalt.err (!%p620_p4)
}
 0x194   :  { %s624_s26 = scalar_lea.hbm %s980_s3, 64 }
 0x195   :  { %p625_p5 = scmp.ne.s32.totalorder %s980_s3, %s624_s26  ;;  %p628_p6 = scmp.lt.u32.totalorder %s624_s26, %s980_s3 }
 0x197   :  { %p630_p7 = pnand %p628_p6, %p625_p5 }
 0x199   :  { %633 = shalt.err (!%p630_p7)
}
 0x19a   :  { %547 = dma.vmem_to_hbm [thread:$0]  %s545_s21, 64, %s980_s3, [#allocation3]   ;;  %537 = vst [vmem:[#allocation4 + $0x3] sm:$0x1] %v528_v6 }
 0x19b   :  { %s634_s7 = scalar_lea.vmem %s946_s23, 64  ;;  %p639_p9 = scmp.lt.s32.totalorder %s946_s23, %s946_s23 }
 0x19c   :  { %p635_p8 = scmp.ne.s32.totalorder %s946_s23, %s634_s7  ;;  %p640_p10 = scmp.lt.s32.totalorder %s634_s7, %s634_s7 }
 0x19e   :  { %p641_p11 = por %p640_p10, %p639_p9 }
 0x1a0   :  { %p642_p12 = pnand %p641_p11, %p635_p8 }
 0x1a2   :  { %645 = shalt.err (!%p642_p12)
}
 0x1a3   :  { %s646_s10 = scalar_lea.hbm %s981_s4, 64 }
 0x1a4   :  { %p647_p13 = scmp.ne.s32.totalorder %s981_s4, %s646_s10  ;;  %p650_p0 = scmp.lt.u32.totalorder %s646_s10, %s981_s4 }
 0x1a6   :  { %p652_p1 = pnand %p650_p0, %p647_p13 }
 0x1a8   :  { %655 = shalt.err (!%p652_p1)
}
 0x1a9   :  { %557 = dma.vmem_to_hbm [thread:$0]  %s946_s23, 64, %s981_s4, [#allocation5]  }
 0x1aa   :  { %656 = dma.done.wait [#allocation3], 64  }
 0x1ab   :  { %657 = vsyncadd [#allocation3], 4294967232 }
 0x1ac   :  { %658 = dma.done.wait [#allocation5], 64  }
 0x1ad   :  { %659 = vsyncadd [#allocation5], 4294967232 }
 0x1ae   :  { %564 = vsyncpa [#allocation3], 1 }
 0x1af   :  { %565 = vsyncpa [#allocation5], 1 }

</bundles_post_ra>
